<compile_context>
chip_gen: v7x
topology: tpu7x:2x2x1
jax: 0.10.0
libtpu: 0.0.40
codegen_flags: <defaults>
</compile_context>

<pallas_src>
import numpy as np
import jax
import jax.numpy as jnp
from jax import lax
from jax.experimental import pallas as pl
from jax.experimental.pallas import tpu as pltpu


# --------------------------------------------------------------------------------------
# helpers
# --------------------------------------------------------------------------------------
def _round_up(x, m):
    return ((x + m - 1) // m) * m


def _sublane(dtype):
    return {4: 8, 2: 16, 1: 32}.get(jnp.dtype(dtype).itemsize, 8)


def _vmem_capacity_bytes():
    try:
        return int(pltpu.get_tpu_info().vmem_capacity_bytes)
    except Exception:
        pass
    try:
        if "v7" in jax.devices()[0].device_kind.lower():
            return 64 * 1024 * 1024
    except Exception:
        pass
    return 128 * 1024 * 1024


def _num_tensorcores():
    try:
        if "v7" in jax.devices()[0].device_kind.lower():
            return 2
    except Exception:
        pass
    return 1


def _adaptive_pool_matrix_t(H, W, P_h, P_w):
    """(H*W, P_h*P_w) matrix; column (p,q) holds 1/bin_size over that output bin's pixels.
    Bin boundaries match torch.nn.AdaptiveAvgPool2d (floor / ceil). Fully vectorized."""
    def axis_weights(L, P):
        i = np.arange(L)[:, None]                      # (L, 1)
        p = np.arange(P)[None, :]                      # (1, P)
        lo = (p * L) // P
        hi = -((-(p + 1) * L) // P)                    # ceil
        m = (i >= lo) & (i < hi)
        return m.astype(np.float32) / (hi - lo).astype(np.float32)
    mh = axis_weights(H, P_h)                          # (H, P_h)
    mw = axis_weights(W, P_w)                          # (W, P_w)
    mat = np.einsum("hp,wq->hwpq", mh, mw).reshape(H * W, P_h * P_w)
    return np.ascontiguousarray(mat, dtype=np.float32)


# --------------------------------------------------------------------------------------
# tiling plan
# --------------------------------------------------------------------------------------
def _plan(N, C_in, C_out, HW, x_dtype, mxu_dtype,
          hw_tile_override=None, split_override=None, pm_resident_override=None):
    x_item = jnp.dtype(x_dtype).itemsize
    pm_item = jnp.dtype(mxu_dtype).itemsize
    c_in_pad = _round_up(C_in, _sublane(x_dtype))

    vmem_cap = _vmem_capacity_bytes()
    vmem_limit = min(vmem_cap * 3 // 4, 112 * 1024 * 1024)   # 96 MiB on v5e/v6e, 48 MiB on v7x
    n_tc = _num_tensorcores()

    # ---- batch blocking (amortise per-step overhead & pool-matrix traffic) ----------
    NB = 1
    max_nb = min(N, 8)
    if n_tc > 1:
        max_nb = min(max_nb, max(1, N // n_tc))   # keep >= n_tc batch blocks when possible
    for cand in range(max_nb, 0, -1):
        if N % cand == 0 and 2 * cand * c_in_pad * 128 * x_item <= vmem_limit // 3:
            NB = cand
            break
    n_b_blocks = N // NB

    # ---- HW tile (include the lane-padded pool-matrix double buffer in the budget) ---
    acc_bytes = NB * _round_up(C_in, 8) * 128 * 4
    w_bytes = 2 * _round_up(C_out, 8) * _round_up(C_in, 128) * 4
    fixed = acc_bytes + w_bytes + (6 << 20)                 # slack: out blocks, shift, sems
    avail = max(vmem_limit - fixed, 2 << 20)
    denom = 2 * NB * c_in_pad * x_item + 2 * 128 * pm_item  # per HW column, both dbl-buffered
    hw_tile_max = max(avail // denom, 1)

    if hw_tile_override is not None:
        hw_tile = min(int(hw_tile_override), HW)
    elif hw_tile_max >= HW or HW <= 128:
        hw_tile = HW
    else:
        hw_tile = max(128, (hw_tile_max // 128) * 128)

    num_k = -(-HW // hw_tile)
    hw_pad = num_k * hw_tile

    # ---- pool-matrix residency (DMA once instead of once per batch block) -----------
    x_block_bytes = NB * c_in_pad * hw_tile * x_item
    pm_res_bytes = 2 * _round_up(hw_pad, 8) * 128 * pm_item   # 2 buffers, lane padded
    budget_left = vmem_limit - fixed - 2 * x_block_bytes
    pm_resident = pm_res_bytes <= min(budget_left, 24 * 1024 * 1024)
    if pm_resident_override is not None:
        pm_resident = bool(pm_resident_override)
    # (non-resident fallback re-streams pool_mat per batch block; its rows are short --
    #  for very large HW on v7x consider a lane-dense repack of pool_mat.)

    # ---- 2-way core split of the reduction (v7x, too few batch blocks) ---------------
    S = 1
    if split_override is not None:
        if num_k % int(split_override) == 0:
            S = int(split_override)
    elif n_tc > 1 and n_b_blocks < n_tc and num_k >= 2 and num_k % 2 == 0:
        S = 2
    k_per_split = num_k // S

    return dict(NB=NB, n_b_blocks=n_b_blocks, hw_tile=hw_tile, num_k=num_k,
                hw_pad=hw_pad, S=S, k_per_split=k_per_split,
                pm_resident=pm_resident, vmem_limit=vmem_limit)


# --------------------------------------------------------------------------------------
# kernel
# --------------------------------------------------------------------------------------
def _make_kernel(*, NB, hw_tile, HW, num_k, k_per_split, mxu_dtype,
                 pm_resident, ragged, fuse_epilogue):

    def kernel(pm_ref, x_ref, w_ref, shift_ref, o_ref, acc_ref):
        s = pl.program_id(1)                    # reduction-split index (v7x)
        k = pl.program_id(2)                    # HW-tile index within the split
        gk = s * k_per_split + k                # global HW-tile index

        @pl.when(k == 0)
        def _init():
            acc_ref[...] = jnp.zeros_like(acc_ref)

        # Pool-matrix tile for this HW slice.
        if pm_resident:
            if num_k == 1:
                pm = pm_ref[...]
            else:
                start = pl.multiple_of(gk * hw_tile, 128)
                pm = pm_ref[pl.ds(start, hw_tile), :]
        else:
            pm = pm_ref[...]
        pm = pm.astype(mxu_dtype)               # no-op (stored in mxu_dtype already)

        if ragged:
            col = lax.broadcasted_iota(jnp.int32, (1, hw_tile), 1)
            valid = HW - gk * hw_tile           # >= hw_tile except on the last global tile

        # Partial adaptive average pool on the MXU (f32 accumulation).
        for b in range(NB):                     # static unroll over the batch block
            xb = x_ref[b]                       # (C_in, hw_tile)
            if ragged:
                xb = jnp.where(col < valid, xb, jnp.zeros_like(xb))
            acc_ref[b] += jnp.dot(xb.astype(mxu_dtype), pm,
                                  preferred_element_type=jnp.float32)

        # Epilogue: folded 1x1 conv (+ BN shift + ReLU when not core-split).
        @pl.when(k == k_per_split - 1)
        def _finalize():
            for b in range(NB):
                y = jnp.dot(w_ref[...], acc_ref[b],          # f32 x f32: single dtype
                            preferred_element_type=jnp.float32)
                if fuse_epilogue:
                    y = jnp.maximum(y + shift_ref[...], 0.0)
                o_ref[b, 0] = y.astype(o_ref.dtype)

    return kernel


# --------------------------------------------------------------------------------------
# wrapper
# --------------------------------------------------------------------------------------
def adapt2_conv2_norm_relu(x, conv_w, gamma, beta, run_mean, run_var, pool_size,
                           eps=1e-5, conv_bias=None, mxu_dtype=None,
                           hw_tile_override=None, split_override=None,
                           pm_resident_override=None):
    N, C_in, H, W = x.shape
    C_out = conv_w.shape[0]
    if isinstance(pool_size, (tuple, list)):
        P_h, P_w = int(pool_size[0]), int(pool_size[1])
    else:
        P_h = P_w = int(pool_size)
    PP = P_h * P_w
    HW = H * W
    out_dt = x.dtype

    if mxu_dtype is None:
        # bf16 MXU path (f32 HBM stream, f32 accumulation) per perf review.
        mxu_dtype = jnp.bfloat16 if x.dtype in (jnp.float32, jnp.bfloat16) else x.dtype

    # ---- fold BatchNorm (eval) + optional conv bias into (w, shift), all f32 ---------
    scale = gamma.astype(jnp.float32) * lax.rsqrt(run_var.astype(jnp.float32) + eps)
    w = conv_w.reshape(C_out, C_in).astype(jnp.float32) * scale[:, None]     # (C_out, C_in)
    b0 = jnp.zeros((C_out,), jnp.float32) if conv_bias is None else conv_bias.astype(jnp.float32)
    shift = beta.astype(jnp.float32) + scale * (b0 - run_mean.astype(jnp.float32))
    shift2d = shift.reshape(C_out, 1)

    plan = _plan(N, C_in, C_out, HW, x.dtype, mxu_dtype,
                 hw_tile_override=hw_tile_override, split_override=split_override,
                 pm_resident_override=pm_resident_override)
    NB, n_b_blocks = plan["NB"], plan["n_b_blocks"]
    hw_tile, num_k, hw_pad = plan["hw_tile"], plan["num_k"], plan["hw_pad"]
    S, k_per_split = plan["S"], plan["k_per_split"]
    pm_resident, vmem_limit = plan["pm_resident"], plan["vmem_limit"]
    ragged = (HW % hw_tile) != 0
    fuse_epilogue = (S == 1)

    pm_np = _adaptive_pool_matrix_t(H, W, P_h, P_w)
    if hw_pad > HW:
        pm_np = np.pad(pm_np, ((0, hw_pad - HW), (0, 0)))    # zero rows for the ragged tail
    pool_mat = jnp.asarray(pm_np, dtype=mxu_dtype)            # (hw_pad, PP)

    x_flat = x.reshape(N, C_in, HW)                           # free reshape of NCHW

    kernel = _make_kernel(NB=NB, hw_tile=hw_tile, HW=HW, num_k=num_k,
                          k_per_split=k_per_split, mxu_dtype=mxu_dtype,
                          pm_resident=pm_resident, ragged=ragged,
                          fuse_epilogue=fuse_epilogue)

    if pm_resident:
        # Constant block index -> fetched from HBM exactly once, stays VMEM-resident.
        pm_spec = pl.BlockSpec((hw_pad, PP), lambda b, s, k: (0, 0))
    else:
        pm_spec = pl.BlockSpec((hw_tile, PP),
                               lambda b, s, k: (s * k_per_split + k, 0))

    out_dtype = out_dt if fuse_epilogue else jnp.float32

    out = pl.pallas_call(
        kernel,
        out_shape=jax.ShapeDtypeStruct((N, S, C_out, PP), out_dtype),
        grid_spec=pltpu.PrefetchScalarGridSpec(
            num_scalar_prefetch=0,
            grid=(n_b_blocks, S, k_per_split),                # reduction axis last
            in_specs=[
                pm_spec,
                pl.BlockSpec((NB, C_in, hw_tile),
                             lambda b, s, k: (b, 0, s * k_per_split + k)),
                pl.BlockSpec((C_out, C_in), lambda b, s, k: (0, 0)),
                pl.BlockSpec((C_out, 1), lambda b, s, k: (0, 0)),
            ],
            out_specs=pl.BlockSpec((NB, 1, C_out, PP), lambda b, s, k: (b, s, 0, 0)),
            scratch_shapes=[pltpu.VMEM((NB, C_in, PP), jnp.float32)],
        ),
        compiler_params=pltpu.CompilerParams(
            dimension_semantics=("parallel", "parallel", "arbitrary"),
            vmem_limit_bytes=int(vmem_limit)),
    )(pool_mat, x_flat, w, shift2d)

    if fuse_epilogue:
        y = out[:, 0]
    else:
        # S>1: partial conv results are linear -> sum over splits, then BN shift + ReLU.
        y = jnp.maximum(out.sum(axis=1) + shift.reshape(1, C_out, 1), 0.0).astype(out_dt)
    return y.reshape(N, C_out, P_h, P_w)


# --------------------------------------------------------------------------------------
# pure-JAX reference (PyTorch AdaptiveAvgPool2d bin semantics, BatchNorm eval mode)
# --------------------------------------------------------------------------------------
def _reference(x, conv_w, gamma, beta, run_mean, run_var, pool_size, eps=1e-5):
    N, C_in, H, W = x.shape
    if isinstance(pool_size, (tuple, list)):
        P_h, P_w = pool_size
    else:
        P_h = P_w = pool_size
    xf = x.astype(jnp.float32)
    rows = []
    for p in range(P_h):
        h0, h1 = (p * H) // P_h, -((-(p + 1) * H) // P_h)
        cols = []
        for q in range(P_w):
            w0, w1 = (q * W) // P_w, -((-(q + 1) * W) // P_w)
            cols.append(xf[:, :, h0:h1, w0:w1].mean(axis=(2, 3)))
        rows.append(jnp.stack(cols, axis=-1))
    pooled = jnp.stack(rows, axis=-2)                         # (N, C_in, P_h, P_w)
    wmat = conv_w[:, :, 0, 0].astype(jnp.float32)
    y = jnp.einsum("ncpq,oc->nopq", pooled, wmat)
    scale = gamma / jnp.sqrt(run_var + eps)
    shift = beta - run_mean * scale
    y = y * scale[None, :, None, None] + shift[None, :, None, None]
    return jnp.maximum(y, 0.0)


# --------------------------------------------------------------------------------------
# self-test
# --------------------------------------------------------------------------------------
if __name__ == "__main__":
    # TODO(synk): BatchNorm2d training-mode statistics updates are not implemented;
    # the kernel implements inference (eval) semantics with running stats folded in.

    def make_inputs(key, N, C_in, C_out, H, W):
        ks = jax.random.split(key, 6)
        x = jax.random.normal(ks[0], (N, C_in, H, W), jnp.float32)
        conv_w = jax.random.normal(ks[1], (C_out, C_in, 1, 1), jnp.float32) * 0.1
        gamma = 1.0 + 0.1 * jax.random.normal(ks[2], (C_out,), jnp.float32)
        beta = 0.1 * jax.random.normal(ks[3], (C_out,), jnp.float32)
        mean = 0.1 * jax.random.normal(ks[4], (C_out,), jnp.float32)
        var = jax.random.uniform(ks[5], (C_out,), jnp.float32, minval=0.5, maxval=1.5)
        return x, conv_w, gamma, beta, mean, var

    key = jax.random.PRNGKey(0)
    k1, k2 = jax.random.split(key, 2)

    # --- Test A: primary shapes, f32 MXU path (tight tolerance) -----------------------
    args = make_inputs(k1, N=2, C_in=4, C_out=8, H=16, W=16)
    out = jax.block_until_ready(
        adapt2_conv2_norm_relu(*args, pool_size=4, mxu_dtype=jnp.float32))
    ref = _reference(*args, pool_size=4)
    assert out.shape == (2, 8, 4, 4)
    assert jnp.allclose(out, ref, atol=1e-5, rtol=1e-5), "f32 path mismatch"

    # --- Test B: same shapes, default in-kernel bf16 MXU cast (HBM-roofline path) -----
    out_bf = jax.block_until_ready(adapt2_conv2_norm_relu(*args, pool_size=4))
    assert out_bf.shape == (2, 8, 4, 4)
    assert jnp.allclose(out_bf, ref, atol=1e-2, rtol=1e-2), "bf16 MXU path mismatch"

    # --- Test C: non-divisible adaptive bins + forced HW tiling (ragged tail mask) +
    #             forced 2-way reduction split (wrapper epilogue) + streamed pool matrix
    #             (the non-resident fallback). --------------------------------------
    args_c = make_inputs(k2, N=2, C_in=4, C_out=8, H=20, W=20)
    out_c = jax.block_until_ready(
        adapt2_conv2_norm_relu(*args_c, pool_size=3, mxu_dtype=jnp.float32,
                               hw_tile_override=128, split_override=2,
                               pm_resident_override=False))
    ref_c = _reference(*args_c, pool_size=3)
    assert out_c.shape == (2, 8, 3, 3)
    assert jnp.allclose(out_c, ref_c, atol=1e-5, rtol=1e-5), "tiled/split path mismatch"

    print("KERNEL_OK")
</pallas_src>

<mosaic_0001>
module attributes {stable_mosaic.version = 11 : i64} {
  func.func @kernel(%arg0: i32, %arg1: i32, %arg2: i32, %arg3: memref<256x16xf32, #tpu.memory_space<vmem>>, %arg4: memref<2x4x256xf32, #tpu.memory_space<vmem>>, %arg5: memref<8x4xf32, #tpu.memory_space<vmem>>, %arg6: memref<8x1xf32, #tpu.memory_space<vmem>>, %arg7: memref<2x1x8x16xf32, #tpu.memory_space<vmem>>, %arg8: memref<2x4x16xf32, #tpu.memory_space<vmem>>) attributes {dimension_semantics = [#tpu.dimension_semantics<parallel>, #tpu.dimension_semantics<parallel>, #tpu.dimension_semantics<arbitrary>], iteration_bounds = array<i64: 1, 1, 1>, scalar_prefetch = 0 : i64, scratch_operands = 1 : i64, tpu.core_type = #tpu.core_type<tc>, window_params = [{pipeline_mode = #tpu.pipeline_mode<synchronous>, transform_indices = @transform_0, window_bounds = array<i64: 256, 16>}, {transform_indices = @transform_1, window_bounds = array<i64: 2, 4, 256>}, {pipeline_mode = #tpu.pipeline_mode<synchronous>, transform_indices = @transform_2, window_bounds = array<i64: 8, 4>}, {pipeline_mode = #tpu.pipeline_mode<synchronous>, transform_indices = @transform_3, window_bounds = array<i64: 8, 1>}, {transform_indices = @transform_4, window_bounds = array<i64: 2, 1, 8, 16>}]} {
    %c0_i32 = arith.constant 0 : i32
    %0 = arith.cmpi eq, %arg2, %c0_i32 : i32
    %1 = arith.extui %0 : i1 to i32
    %c0_i32_0 = arith.constant 0 : i32
    %2 = arith.cmpi ne, %1, %c0_i32_0 : i32
    scf.if %2 {
      %cst_22 = arith.constant 0.000000e+00 : f32
      %25 = vector.broadcast %cst_22 : f32 to vector<2x4x16xf32>
      %c0_23 = arith.constant 0 : index
      %c0_24 = arith.constant 0 : index
      %c0_25 = arith.constant 0 : index
      %26 = vector.load %arg8[%c0_23, %c0_24, %c0_25] : memref<2x4x16xf32, #tpu.memory_space<vmem>>, vector<2x4x16xf32>
      tpu.vector_store %arg8[%c0_23, %c0_24, %c0_25], %25 {strides = array<i32>} : memref<2x4x16xf32, #tpu.memory_space<vmem>>, vector<2x4x16xf32>,
    } else {
    }
    %c0 = arith.constant 0 : index
    %c0_1 = arith.constant 0 : index
    %3 = vector.load %arg3[%c0, %c0_1] : memref<256x16xf32, #tpu.memory_space<vmem>>, vector<256x16xf32>
    %c0_2 = arith.constant 0 : index
    %c0_3 = arith.constant 0 : index
    %c0_4 = arith.constant 0 : index
    %4 = vector.load %arg4[%c0_2, %c0_3, %c0_4] : memref<2x4x256xf32, #tpu.memory_space<vmem>>, vector<1x4x256xf32>
    %5 = vector.shape_cast %4 : vector<1x4x256xf32> to vector<4x256xf32>
    %c0_5 = arith.constant 0 : index
    %c0_6 = arith.constant 0 : index
    %c0_7 = arith.constant 0 : index
    %6 = vector.load %arg8[%c0_5, %c0_6, %c0_7] : memref<2x4x16xf32, #tpu.memory_space<vmem>>, vector<1x4x16xf32>
    %7 = vector.shape_cast %6 : vector<1x4x16xf32> to vector<4x16xf32>
    %cst = arith.constant dense<0.000000e+00> : vector<4x16xf32>
    %8 = tpu.matmul %5, %3, %cst {dimension_numbers = #tpu.dot_dimension_numbers<[1], [0], [0], [1], [0, 0, 1, 1], [], []>} : vector<4x256xf32>, vector<256x16xf32>, vector<4x16xf32> -> vector<4x16xf32>
    %9 = arith.addf %7, %8 : vector<4x16xf32>
    %c0_8 = arith.constant 0 : index
    %c0_9 = arith.constant 0 : index
    %c0_10 = arith.constant 0 : index
    %10 = vector.load %arg8[%c0_8, %c0_9, %c0_10] : memref<2x4x16xf32, #tpu.memory_space<vmem>>, vector<1x4x16xf32>
    %11 = vector.shape_cast %10 : vector<1x4x16xf32> to vector<4x16xf32>
    %12 = vector.shape_cast %9 : vector<4x16xf32> to vector<1x4x16xf32>
    tpu.vector_store %arg8[%c0_8, %c0_9, %c0_10], %12 {strides = array<i32>} : memref<2x4x16xf32, #tpu.memory_space<vmem>>, vector<1x4x16xf32>,
    %c1 = arith.constant 1 : index
    %c0_11 = arith.constant 0 : index
    %c0_12 = arith.constant 0 : index
    %13 = vector.load %arg4[%c1, %c0_11, %c0_12] : memref<2x4x256xf32, #tpu.memory_space<vmem>>, vector<1x4x256xf32>
    %14 = vector.shape_cast %13 : vector<1x4x256xf32> to vector<4x256xf32>
    %c1_13 = arith.constant 1 : index
    %c0_14 = arith.constant 0 : index
    %c0_15 = arith.constant 0 : index
    %15 = vector.load %arg8[%c1_13, %c0_14, %c0_15] : memref<2x4x16xf32, #tpu.memory_space<vmem>>, vector<1x4x16xf32>
    %16 = vector.shape_cast %15 : vector<1x4x16xf32> to vector<4x16xf32>
    %cst_16 = arith.constant dense<0.000000e+00> : vector<4x16xf32>
    %17 = tpu.matmul %14, %3, %cst_16 {dimension_numbers = #tpu.dot_dimension_numbers<[1], [0], [0], [1], [0, 0, 1, 1], [], []>} : vector<4x256xf32>, vector<256x16xf32>, vector<4x16xf32> -> vector<4x16xf32>
    %18 = arith.addf %16, %17 : vector<4x16xf32>
    %c1_17 = arith.constant 1 : index
    %c0_18 = arith.constant 0 : index
    %c0_19 = arith.constant 0 : index
    %19 = vector.load %arg8[%c1_17, %c0_18, %c0_19] : memref<2x4x16xf32, #tpu.memory_space<vmem>>, vector<1x4x16xf32>
    %20 = vector.shape_cast %19 : vector<1x4x16xf32> to vector<4x16xf32>
    %21 = vector.shape_cast %18 : vector<4x16xf32> to vector<1x4x16xf32>
    tpu.vector_store %arg8[%c1_17, %c0_18, %c0_19], %21 {strides = array<i32>} : memref<2x4x16xf32, #tpu.memory_space<vmem>>, vector<1x4x16xf32>,
    %c0_i32_20 = arith.constant 0 : i32
    %22 = arith.cmpi eq, %arg2, %c0_i32_20 : i32
    %23 = arith.extui %22 : i1 to i32
    %c0_i32_21 = arith.constant 0 : i32
    %24 = arith.cmpi ne, %23, %c0_i32_21 : i32
    scf.if %24 {
      %c0_22 = arith.constant 0 : index
      %c0_23 = arith.constant 0 : index
      %25 = vector.load %arg5[%c0_22, %c0_23] : memref<8x4xf32, #tpu.memory_space<vmem>>, vector<8x4xf32>
      %c0_24 = arith.constant 0 : index
      %c0_25 = arith.constant 0 : index
      %c0_26 = arith.constant 0 : index
      %26 = vector.load %arg8[%c0_24, %c0_25, %c0_26] : memref<2x4x16xf32, #tpu.memory_space<vmem>>, vector<1x4x16xf32>
      %27 = vector.shape_cast %26 : vector<1x4x16xf32> to vector<4x16xf32>
      %cst_27 = arith.constant dense<0.000000e+00> : vector<8x16xf32>
      %28 = tpu.matmul %25, %27, %cst_27 {dimension_numbers = #tpu.dot_dimension_numbers<[1], [0], [0], [1], [0, 0, 1, 1], [], []>} : vector<8x4xf32>, vector<4x16xf32>, vector<8x16xf32> -> vector<8x16xf32>
      %c0_28 = arith.constant 0 : index
      %c0_29 = arith.constant 0 : index
      %29 = vector.load %arg6[%c0_28, %c0_29] : memref<8x1xf32, #tpu.memory_space<vmem>>, vector<8x1xf32>
      %30 = vector.broadcast %29 : vector<8x1xf32> to vector<8x16xf32>
      %31 = arith.addf %28, %30 : vector<8x16xf32>
      %cst_30 = arith.constant 0.000000e+00 : f32
      %32 = vector.broadcast %cst_30 : f32 to vector<8x16xf32>
      %33 = arith.maximumf %31, %32 : vector<8x16xf32>
      %c0_31 = arith.constant 0 : index
      %c0_32 = arith.constant 0 : index
      %c0_33 = arith.constant 0 : index
      %c0_34 = arith.constant 0 : index
      %34 = vector.load %arg7[%c0_31, %c0_32, %c0_33, %c0_34] : memref<2x1x8x16xf32, #tpu.memory_space<vmem>>, vector<1x1x8x16xf32>
      %35 = vector.shape_cast %34 : vector<1x1x8x16xf32> to vector<8x16xf32>
      %36 = vector.shape_cast %33 : vector<8x16xf32> to vector<1x1x8x16xf32>
      tpu.vector_store %arg7[%c0_31, %c0_32, %c0_33, %c0_34], %36 {strides = array<i32>} : memref<2x1x8x16xf32, #tpu.memory_space<vmem>>, vector<1x1x8x16xf32>,
      %c0_35 = arith.constant 0 : index
      %c0_36 = arith.constant 0 : index
      %37 = vector.load %arg5[%c0_35, %c0_36] : memref<8x4xf32, #tpu.memory_space<vmem>>, vector<8x4xf32>
      %c1_37 = arith.constant 1 : index
      %c0_38 = arith.constant 0 : index
      %c0_39 = arith.constant 0 : index
      %38 = vector.load %arg8[%c1_37, %c0_38, %c0_39] : memref<2x4x16xf32, #tpu.memory_space<vmem>>, vector<1x4x16xf32>
      %39 = vector.shape_cast %38 : vector<1x4x16xf32> to vector<4x16xf32>
      %cst_40 = arith.constant dense<0.000000e+00> : vector<8x16xf32>
      %40 = tpu.matmul %37, %39, %cst_40 {dimension_numbers = #tpu.dot_dimension_numbers<[1], [0], [0], [1], [0, 0, 1, 1], [], []>} : vector<8x4xf32>, vector<4x16xf32>, vector<8x16xf32> -> vector<8x16xf32>
      %c0_41 = arith.constant 0 : index
      %c0_42 = arith.constant 0 : index
      %41 = vector.load %arg6[%c0_41, %c0_42] : memref<8x1xf32, #tpu.memory_space<vmem>>, vector<8x1xf32>
      %42 = vector.broadcast %41 : vector<8x1xf32> to vector<8x16xf32>
      %43 = arith.addf %40, %42 : vector<8x16xf32>
      %cst_43 = arith.constant 0.000000e+00 : f32
      %44 = vector.broadcast %cst_43 : f32 to vector<8x16xf32>
      %45 = arith.maximumf %43, %44 : vector<8x16xf32>
      %c1_44 = arith.constant 1 : index
      %c0_45 = arith.constant 0 : index
      %c0_46 = arith.constant 0 : index
      %c0_47 = arith.constant 0 : index
      %46 = vector.load %arg7[%c1_44, %c0_45, %c0_46, %c0_47] : memref<2x1x8x16xf32, #tpu.memory_space<vmem>>, vector<1x1x8x16xf32>
      %47 = vector.shape_cast %46 : vector<1x1x8x16xf32> to vector<8x16xf32>
      %48 = vector.shape_cast %45 : vector<8x16xf32> to vector<1x1x8x16xf32>
      tpu.vector_store %arg7[%c1_44, %c0_45, %c0_46, %c0_47], %48 {strides = array<i32>} : memref<2x1x8x16xf32, #tpu.memory_space<vmem>>, vector<1x1x8x16xf32>,
    } else {
    }
    return
  }
  func.func @transform_0(%arg0: i32, %arg1: i32, %arg2: i32) -> (i32, i32) {
    %c0_i32 = arith.constant 0 : i32
    %c0_i32_0 = arith.constant 0 : i32
    %c0_i32_1 = arith.constant 0 : i32
    return %c0_i32, %c0_i32_0 : i32, i32
  }
  func.func @transform_1(%arg0: i32, %arg1: i32, %arg2: i32) -> (i32, i32, i32) {
    %c1_i32 = arith.constant 1 : i32
    %0 = arith.muli %arg1, %c1_i32 : i32
    %1 = arith.addi %0, %arg2 : i32
    %c0_i32 = arith.constant 0 : i32
    %c0_i32_0 = arith.constant 0 : i32
    return %arg0, %c0_i32, %1 : i32, i32, i32
  }
  func.func @transform_2(%arg0: i32, %arg1: i32, %arg2: i32) -> (i32, i32) {
    %c0_i32 = arith.constant 0 : i32
    %c0_i32_0 = arith.constant 0 : i32
    %c0_i32_1 = arith.constant 0 : i32
    return %c0_i32, %c0_i32_0 : i32, i32
  }
  func.func @transform_3(%arg0: i32, %arg1: i32, %arg2: i32) -> (i32, i32) {
    %c0_i32 = arith.constant 0 : i32
    %c0_i32_0 = arith.constant 0 : i32
    %c0_i32_1 = arith.constant 0 : i32
    return %c0_i32, %c0_i32_0 : i32, i32
  }
  func.func @transform_4(%arg0: i32, %arg1: i32, %arg2: i32) -> (i32, i32, i32, i32) {
    %c0_i32 = arith.constant 0 : i32
    %c0_i32_0 = arith.constant 0 : i32
    %c0_i32_1 = arith.constant 0 : i32
    return %arg0, %arg1, %c0_i32, %c0_i32_0 : i32, i32, i32, i32
  }
}

</mosaic_0001>

<bundles_post_ra>
// kernel: tpu_custom_call.1
= control target key start
LH: loop header
LB: loop body
LE: loop exit
PB: predicated region body
PF: predicated region fallthrough
CT: control target
= control target key end

     0   :  { %9 = vsyncpa [#allocation4], 0  ;;  %s867_s0 = inlined_call_operand.hbm [shape: f32[256,16], index: 0, kind: input, shape index: {}]   ;;  %s868_s1 = inlined_call_operand.hbm [shape: f32[2,4,256], index: 1, kind: input, shape index: {}]   ;;  %s869_s2 = inlined_call_operand.hbm [shape: f32[8,4], index: 2, kind: input, shape index: {}]   ;;  %s870_s3 = inlined_call_operand.hbm [shape: f32[8,1], index: 3, kind: input, shape index: {}]   ;;  %s871_s4 = inlined_call_operand.hbm [shape: f32[2,1,8,16], index: 4, kind: output, shape index: {}]  }
   0x1   :  { %10 = vsyncpa [#allocation7], 0 }
   0x2   :  { %11 = vsyncpa [#allocation10], 0 }
   0x3   :  { %12 = vsyncpa [#allocation5], 0  ;;  %s752_s15 = smov [#allocation6]   ;;  %s753_s17 = smov [#allocation3]  }
   0x4   :  { %s34_s16 = sshll.u32 %s752_s15, 4  ;;  %s18_s18 = sshll.u32 %s753_s17, 4  ;;  %s35_s16 = int_to_ptr.vmem [resolvable:$true] %s34_s16  ;;  %s787_s18 = int_to_ptr.vmem [resolvable:$true] %s18_s18 }
   0x5   :  { %s634_s21 = scalar_lea.hbm %s868_s1, 256 }
   0x6   :  { %p635_p0 = scmp.ne.s32.totalorder %s868_s1, %s634_s21  ;;  %p638_p1 = scmp.lt.u32.totalorder %s634_s21, %s868_s1 }
   0x8   :  { %p640_p2 = pnand %p638_p1, %p635_p0 }
   0xa   :  { %643 = shalt.err (!%p640_p2)
}
   0xb   :  { %s644_s26 = scalar_lea.vmem %s35_s16, 256  ;;  %p649_p4 = scmp.lt.s32.totalorder %s35_s16, %s35_s16 }
   0xc   :  { %p645_p3 = scmp.ne.s32.totalorder %s35_s16, %s644_s26  ;;  %p650_p5 = scmp.lt.s32.totalorder %s644_s26, %s644_s26 }
   0xe   :  { %p651_p6 = por %p650_p5, %p649_p4 }
  0x10   :  { %p652_p7 = pnand %p651_p6, %p645_p3 }
  0x12   :  { %655 = shalt.err (!%p652_p7)
}
  0x13   :  { %s754_s27 = smov 128   ;;  %s755_s28 = smov 8  }
  0x14   :  { %40 = dma.hbm_to_vmem [thread:$0]  %s868_s1, 256, %s35_s16, [#allocation7], %s754_s27, %s754_s27, %s755_s28  }
  0x15   :  { %s656_s7 = scalar_lea.hbm %s867_s0, 4096 }
  0x16   :  { %p657_p8 = scmp.ne.s32.totalorder %s867_s0, %s656_s7  ;;  %p660_p9 = scmp.lt.u32.totalorder %s656_s7, %s867_s0 }
  0x18   :  { %p662_p10 = pnand %p660_p9, %p657_p8 }
  0x1a   :  { %665 = shalt.err (!%p662_p10)
}
  0x1b   :  { %s666_s12 = scalar_lea.vmem %s787_s18, 4096  ;;  %p671_p12 = scmp.lt.s32.totalorder %s787_s18, %s787_s18 }
  0x1c   :  { %p667_p11 = scmp.ne.s32.totalorder %s787_s18, %s666_s12  ;;  %p672_p13 = scmp.lt.s32.totalorder %s666_s12, %s666_s12 }
  0x1e   :  { %p673_p0 = por %p672_p13, %p671_p12 }
  0x20   :  { %p674_p1 = pnand %p673_p0, %p667_p11 }
  0x22   :  { %677 = shalt.err (!%p674_p1)
}
  0x23   :  { %24 = dma.hbm_to_vmem [thread:$0]  %s867_s0, 4096, %s787_s18, [#allocation4], %s754_s27, %s754_s27, %s755_s28  }
  0x24   :  { %s756_s14 = smov [#allocation8]   ;;  %s757_s16 = smov [#allocation9]  }
  0x25   :  { %s47_s15 = sshll.u32 %s756_s14, 4  ;;  %s57_s17 = sshll.u32 %s757_s16, 4  ;;  %s48_s15 = int_to_ptr.vmem [resolvable:$true] %s47_s15  ;;  %s58_s17 = int_to_ptr.vmem [resolvable:$true] %s57_s17 }
  0x26   :  { %s678_s21 = scalar_lea.hbm %s869_s2, 128 }
  0x27   :  { %p679_p2 = scmp.ne.s32.totalorder %s869_s2, %s678_s21  ;;  %p682_p3 = scmp.lt.u32.totalorder %s678_s21, %s869_s2 }
  0x29   :  { %p684_p4 = pnand %p682_p3, %p679_p2 }
  0x2b   :  { %687 = shalt.err (!%p684_p4)
}
  0x2c   :  { %s688_s0 = scalar_lea.vmem %s48_s15, 128  ;;  %p693_p6 = scmp.lt.s32.totalorder %s48_s15, %s48_s15 }
  0x2d   :  { %p689_p5 = scmp.ne.s32.totalorder %s48_s15, %s688_s0  ;;  %p694_p7 = scmp.lt.s32.totalorder %s688_s0, %s688_s0 }
  0x2f   :  { %p695_p8 = por %p694_p7, %p693_p6 }
  0x31   :  { %p696_p9 = pnand %p695_p8, %p689_p5 }
  0x33   :  { %699 = shalt.err (!%p696_p9)
}
  0x34   :  { %50 = dma.hbm_to_vmem [thread:$0]  %s869_s2, 128, %s48_s15, [#allocation7]  }
  0x35   :  { %s700_s5 = scalar_lea.hbm %s870_s3, 128 }
  0x36   :  { %p701_p10 = scmp.ne.s32.totalorder %s870_s3, %s700_s5  ;;  %p704_p11 = scmp.lt.u32.totalorder %s700_s5, %s870_s3 }
  0x38   :  { %p706_p12 = pnand %p704_p11, %p701_p10 }
  0x3a   :  { %709 = shalt.err (!%p706_p12)
}
  0x3b   :  { %s710_s10 = scalar_lea.vmem %s58_s17, 128  ;;  %p715_p0 = scmp.lt.s32.totalorder %s58_s17, %s58_s17 }
  0x3c   :  { %p711_p13 = scmp.ne.s32.totalorder %s58_s17, %s710_s10  ;;  %p716_p1 = scmp.lt.s32.totalorder %s710_s10, %s710_s10 }
  0x3e   :  { %p717_p2 = por %p716_p1, %p715_p0 }
  0x40   :  { %p718_p3 = pnand %p717_p2, %p711_p13 }
  0x42   :  { %721 = shalt.err (!%p718_p3)
}
  0x43   :  { %60 = dma.hbm_to_vmem [thread:$0]  %s870_s3, 128, %s58_s17, [#allocation10]  }
  0x44   :  { %744 = dma.done.wait [#allocation4], 4096  }
  0x45   :  { %745 = vsyncadd [#allocation4], 4294963200 }
  0x46   :  { %746 = dma.done.wait [#allocation7], 384  }
  0x47   :  { %747 = vsyncadd [#allocation7], 4294966912 }
  0x48   :  { %748 = dma.done.wait [#allocation10], 128  }
  0x49   :  { %749 = vsyncadd [#allocation10], 4294967168  ;;  %v98_v0 = vld [vmem:[#allocation3 + $0x80] sm:$0xff]  ;;  %v99_v1 = vld [vmem:[#allocation3 + $0x88] sm:$0xff]  ;;  %vm79_vm0 = vcmask 125952   ;;  %v758_v52 = vmov 0.0  }
  0x4a   :  { %v82_v2 = vld [vmem:[#allocation3] sm:$0xff]  ;;  %v557_v3 = vpack.c.bf16 %v99_v1, %v98_v0  ;;  %v83_v4 = vld [vmem:[#allocation3 + $0x8] sm:$0xff]  ;;  %v100_v5 = vld [vmem:[#allocation3 + $0x90] sm:$0xff]  ;;  %80 = vst.msk [vmem:[#allocation2] sm:$0xf] %vm79_vm0, %v758_v52  ;;  %vm759_vm1 = vmmov 0  }
  0x4b   :  { %v101_v6 = vld [vmem:[#allocation3 + $0x98] sm:$0xff]  ;;  %v559_v7 = vpack.c.bf16 %v83_v4, %v82_v2  ;;  %v84_v9 = vld [vmem:[#allocation3 + $0x10] sm:$0xff]  ;;  %v102_v11 = vld [vmem:[#allocation3 + $0xa0] sm:$0xff]  ;;  %81 = vst.msk [vmem:[#allocation2 + $0x4] sm:$0xf] %vm79_vm0, %v758_v52  ;;  %v760_v54 = vmov 0  }
  0x4c   :  { %v561_v8 = vpack.c.bf16 %v101_v6, %v100_v5  ;;  %v85_v10 = vld [vmem:[#allocation3 + $0x18] sm:$0xff]  ;;  %558 = vmatprep.subr.bf16.mxu0 %v557_v3  ;;  %590 = vmatprep.subr.bf16.mxu1 %v557_v3  ;;  %v103_v12 = vld [vmem:[#allocation3 + $0xa8] sm:$0xff]  ;;  %v86_v15 = vld [vmem:[#allocation3 + $0x20] sm:$0xff]  ;;  %vm286_vm2 = vcmask 1043456   ;;  %vm282_vm3 = vcmask 31744   ;;  %s761_s3 = smov [#allocation11]  }
  0x4d   :  { %560 = vmatpush3.bf16.msra.mxu0 %v559_v7  ;;  %592 = vmatpush3.bf16.msra.mxu1 %v559_v7  ;;  %v563_v13 = vpack.c.bf16 %v85_v10, %v84_v9  ;;  %v565_v14 = vpack.c.bf16 %v103_v12, %v102_v11  ;;  %v87_v16 = vld [vmem:[#allocation3 + $0x28] sm:$0xff]  ;;  %v104_v17 = vld [vmem:[#allocation3 + $0xb0] sm:$0xff]  ;;  %v105_v18 = vld [vmem:[#allocation3 + $0xb8] sm:$0xff]  ;;  %s455_s12 = sshll.u32 %s761_s3, 4  ;;  %vm361_vm4 = vcmask 130048   ;;  %s456_s12 = int_to_ptr.vmem [resolvable:$true] %s455_s12 }
  0x4e   :  { %562 = vmatprep.subr.bf16.mxu0 %v561_v8  ;;  %594 = vmatprep.subr.bf16.mxu1 %v561_v8  ;;  %v567_v19 = vpack.c.bf16 %v87_v16, %v86_v15  ;;  %v569_v20 = vpack.c.bf16 %v105_v18, %v104_v17  ;;  %v88_v21 = vld [vmem:[#allocation3 + $0x30] sm:$0xff]  ;;  %v89_v22 = vld [vmem:[#allocation3 + $0x38] sm:$0xff]  ;;  %v106_v23 = vld [vmem:[#allocation3 + $0xc0] sm:$0xff]  ;;  %s722_s1 = scalar_lea.vmem %s456_s12, 256  ;;  %p727_p5 = scmp.lt.s32.totalorder %s456_s12, %s456_s12 }
  0x4f   :  { %v107_v24 = vld [vmem:[#allocation3 + $0xc8] sm:$0xff]  ;;  %v114_v25 = vld [vmem:[#allocation6] sm:$0xff]  ;;  %v571_v28 = vpack.c.bf16 %v89_v22, %v88_v21  ;;  %v108_v33 = vld [vmem:[#allocation3 + $0xd0] sm:$0xff]  ;;  %631 = vset.pattern.permute.xlu0 %v760_v54  ;;  %p723_p4 = scmp.ne.s32.totalorder %s456_s12, %s722_s1  ;;  %p728_p6 = scmp.lt.s32.totalorder %s722_s1, %s722_s1 }
  0x50   :  { %v117_v26 = vcombine.high %v114_v25, %v114_v25  ;;  %v193_v27 = vld [vmem:[#allocation6 + $0x8] sm:$0xff]  ;;  %v573_v30 = vpack.c.bf16 %v107_v24, %v106_v23  ;;  %v90_v31 = vld [vmem:[#allocation3 + $0x40] sm:$0xff]  ;;  %v109_v34 = vld [vmem:[#allocation3 + $0xd8] sm:$0xff] }
  0x51   :  { %564 = vmatpush3.bf16.msra.mxu0 %v563_v13  ;;  %596 = vmatpush3.bf16.msra.mxu1 %v563_v13  ;;  %v197_v29 = vcombine.high %v193_v27, %v193_v27  ;;  %v91_v32 = vld [vmem:[#allocation3 + $0x48] sm:$0xff]  ;;  %v577_v36 = vpack.c.bf16 %v109_v34, %v108_v33  ;;  %v92_v37 = vld [vmem:[#allocation3 + $0x50] sm:$0xff]  ;;  %v93_v38 = vld [vmem:[#allocation3 + $0x58] sm:$0xff]  ;;  %p729_p7 = por %p728_p6, %p727_p5 }
  0x52   :  { %566 = vmatprep.subr.bf16.mxu0 %v565_v14  ;;  %598 = vmatprep.subr.bf16.mxu1 %v565_v14  ;;  %v575_v35 = vpack.c.bf16 %v91_v32, %v90_v31  ;;  %v110_v39 = vld [vmem:[#allocation3 + $0xe0] sm:$0xff]  ;;  %v111_v40 = vld [vmem:[#allocation3 + $0xe8] sm:$0xff]  ;;  %v579_v41 = vpack.c.bf16 %v93_v38, %v92_v37  ;;  %v112_v45 = vld [vmem:[#allocation3 + $0xf0] sm:$0xff] }
  0x53   :  { %183 = vmatprep.mubr.f32.mxu0 %v117_v26  ;;  %263 = vmatprep.mubr.f32.mxu1 %v197_v29  ;;  %v581_v42 = vpack.c.bf16 %v111_v40, %v110_v39  ;;  %v94_v43 = vld [vmem:[#allocation3 + $0x60] sm:$0xff]  ;;  %v95_v44 = vld [vmem:[#allocation3 + $0x68] sm:$0xff]  ;;  %v113_v46 = vld [vmem:[#allocation3 + $0xf8] sm:$0xff]  ;;  %p730_p8 = pnand %p729_p7, %p723_p4 }
  0x54   :  { %v583_v47 = vpack.c.bf16 %v95_v44, %v94_v43  ;;  %v585_v48 = vpack.c.bf16 %v113_v46, %v112_v45  ;;  %v96_v49 = vld [vmem:[#allocation3 + $0x70] sm:$0xff]  ;;  %v97_v50 = vld [vmem:[#allocation3 + $0x78] sm:$0xff] }
  0x55   :  { %568 = vmatpush3.bf16.msra.mxu0 %v567_v19  ;;  %600 = vmatpush3.bf16.msra.mxu1 %v567_v19  ;;  %v587_v51 = vpack.c.bf16 %v97_v50, %v96_v49  ;;  %v276_v53 = vld [vmem:[#allocation9] sm:$0xff]  ;;  %v274_v1 = vld [vmem:[#allocation8] sm:$0xff] }
  0x56   :  { %570 = vmatprep.subr.bf16.mxu0 %v569_v20  ;;  %602 = vmatprep.subr.bf16.mxu1 %v569_v20  ;;  %v115_v57 = vld [vmem:[#allocation2] sm:$0xf]  ;;  %v195_v59 = vld [vmem:[#allocation2 + $0x4] sm:$0xf] }
  0x57   :  { %279 = vperm.xlu0 %631, %v276_v53  }
  0x59   :  { %572 = vmatpush3.bf16.msra.mxu0 %v571_v28  ;;  %604 = vmatpush3.bf16.msra.mxu1 %v571_v28 }
  0x5a   :  { %574 = vmatprep.subr.bf16.mxu0 %v573_v30  ;;  %606 = vmatprep.subr.bf16.mxu1 %v573_v30 }
  0x5b   :  { %368 = vperm.xlu0 %631, %v276_v53  }
  0x5d   :  { %576 = vmatpush3.bf16.msra.mxu0 %v575_v35  ;;  %608 = vmatpush3.bf16.msra.mxu1 %v575_v35 }
  0x5e   :  { %578 = vmatprep.subr.bf16.mxu0 %v577_v36  ;;  %610 = vmatprep.subr.bf16.mxu1 %v577_v36 }
  0x61   :  { %580 = vmatpush3.bf16.msra.mxu0 %v579_v41  ;;  %612 = vmatpush3.bf16.msra.mxu1 %v579_v41 }
  0x62   :  { %582 = vmatprep.subr.bf16.mxu0 %v581_v42  ;;  %614 = vmatprep.subr.bf16.mxu1 %v581_v42 }
  0x65   :  { %584 = vmatpush3.bf16.msra.mxu0 %v583_v47  ;;  %616 = vmatpush3.bf16.msra.mxu1 %v583_v47 }
  0x66   :  { %586 = vmatprep.subr.bf16.mxu0 %v585_v48  ;;  %618 = vmatprep.subr.bf16.mxu1 %v585_v48 }
  0x69   :  { %588 = vmatpush3.bf16.msra.mxu0 %v587_v51  ;;  %620 = vmatpush3.bf16.msra.mxu1 %v587_v51 }
  0x6a   :  { %547 = vmatprep.subr.mxu0 %v758_v52  ;;  %552 = vmatprep.subr.mxu1 %v758_v52 }
  0x6c   :  { %184 = vmatmul.mubr.f32.vlgmr.msra.gmra.mrb[0].mxu0 %v114_v25  ;;  %264 = vmatmul.mubr.f32.vlgmr.msra.gmra.mrb[0].mxu1 %v193_v27 }
  0x6d   :  { %549 = vmatprep.mubr.msk.f32.mxu0 %vm759_vm1, %v758_v52  ;;  %554 = vmatprep.mubr.msk.f32.mxu1 %vm759_vm1, %v758_v52 }
  0xd6   :  { %v280_v4 = vpop.permute.xlu0 %279 }
  0xda   :  { %v369_v5 = vpop.permute.xlu0 %368 }
 0x13f   :  { %v505_v55 = vpop.f32.mrb[0].mxu0  ;;  %v540_v56 = vpop.f32.mrb[0].mxu1 }
 0x140   :  { %v506_v58 = vpop.f32.mrb[1].mxu0  ;;  %v541_v60 = vpop.f32.mrb[1].mxu1 }
 0x141   :  { %v507_v61 = vadd.f32 %v506_v58, %v505_v55  ;;  %v542_v62 = vadd.f32 %v541_v60, %v540_v56 }
 0x143   :  { %v189_v63 = vadd.f32 %v507_v61, %v115_v57  ;;  %v269_v0 = vadd.f32 %v542_v62, %v195_v59 }
 0x145   :  { %191 = vst.msk [vmem:[#allocation2] sm:$0xf] %vm79_vm0, %v189_v63  ;;  %270 = vst.msk [vmem:[#allocation2 + $0x4] sm:$0xf] %vm79_vm0, %v269_v0 }
 0x14c   :  { %v275_v2 = vld [vmem:[#allocation2] sm:$0xf]  ;;  %v364_v3 = vld [vmem:[#allocation2 + $0x4] sm:$0xf] }
 0x14d   :  { %548 = vmatpush3.msk.msra.mxu0 %vm286_vm2, %v275_v2  ;;  %553 = vmatpush3.msk.msra.mxu1 %vm286_vm2, %v364_v3 }
 0x14e   :  { %550 = vmatmul.mubr.msk.f32.vlgmr.msra.gmra.mrb[2].mxu0 %vm282_vm3, %v274_v1  ;;  %555 = vmatmul.mubr.msk.f32.vlgmr.msra.gmra.mrb[2].mxu1 %vm282_vm3, %v274_v1 }
 0x221   :  { %v356_v6 = vpop.f32.mrb[2].mxu0  ;;  %v443_v7 = vpop.f32.mrb[2].mxu1 }
 0x222   :  { %v357_v8 = vadd.f32 %v356_v6, %v280_v4  ;;  %v444_v9 = vadd.f32 %v443_v7, %v369_v5  ;;  %v551_v10 = vpop.f32.mrb[3].mxu0  ;;  %v556_v11 = vpop.f32.mrb[3].mxu1 }
 0x224   :  { %v360_v12 = vmax.f32 %v357_v8, 0.0  ;;  %v447_v13 = vmax.f32 %v444_v9, 0.0 }
 0x226   :  { %362 = vst.msk [vmem:[#allocation11] sm:$0xff] %vm361_vm4, %v360_v12  ;;  %449 = vst.msk [vmem:[#allocation11 + $0x8] sm:$0xff] %vm361_vm4, %v447_v13 }
 0x227   :  { %733 = shalt.err (!%p730_p8)
}
 0x228   :  { %s734_s15 = scalar_lea.hbm %s871_s4, 256 }
 0x229   :  { %p735_p9 = scmp.ne.s32.totalorder %s871_s4, %s734_s15  ;;  %p738_p10 = scmp.lt.u32.totalorder %s734_s15, %s871_s4 }
 0x22b   :  { %p740_p11 = pnand %p738_p10, %p735_p9 }
 0x22d   :  { %743 = shalt.err (!%p740_p11)
}
 0x22e   :  { %461 = dma.vmem_to_hbm [thread:$0]  %s456_s12, 256, %s871_s4, [#allocation5], %s754_s27, %s754_s27, %s755_s28  }
 0x22f   :  { %750 = dma.done.wait [#allocation5], 256  }
 0x230   :  { %751 = vsyncadd [#allocation5], 4294967040 }
 0x231   :  { %465 = vsyncpa [#allocation4], 1 }
 0x232   :  { %466 = vsyncpa [#allocation7], 1 }
 0x233   :  { %467 = vsyncpa [#allocation10], 1 }
 0x234   :  { %468 = vsyncpa [#allocation5], 1 }

</bundles_post_ra>
